<compile_context>
chip_gen: v6e
topology: v6e:2x2x1
jax: 0.10.0
libtpu: 0.0.40
codegen_flags: <defaults>
</compile_context>

<pallas_src>
import jax
import jax.numpy as jnp
from jax.experimental import pallas as pl
from jax.experimental.pallas import tpu as pltpu


# ---------------- kernel: o = (x - shift_row) * inv_scale_row (f32 math) ----------------
def _scaling_kernel(x_ref, shift_ref, inv_scale_ref, o_ref):
    # x_ref:         (TILE_R, TILE_P)  lane-dense spatial tile (input dtype)
    # shift_ref:     (TILE_R, 1)       per-(batch,channel) shift, f32, lane-broadcast
    # inv_scale_ref: (TILE_R, 1)       per-(batch,channel) 1/scale, f32, lane-broadcast
    x = x_ref[...].astype(jnp.float32)
    o_ref[...] = ((x - shift_ref[...]) * inv_scale_ref[...]).astype(o_ref.dtype)


# ---------------- tile sizing from a VMEM byte budget ----------------
_PER_BUFFER_VMEM_BUDGET = 6 * 1024 * 1024   # per pipelined buffer; ~4x this total
_MIN_J_STEPS = 4                            # keep pipelining + both v7x TCs busy
_MAX_TILE_R = 512
_PALLAS_MIN_BYTES = 1 << 20                 # below this, plain jnp is just as fast


def _round_down_multiple(x, m):
    return (x // m) * m


def _choose_tiles(R, P, elem_bytes):
    """Pick (TILE_R, TILE_P) for a (R, P) lane-dense view.

    TILE_R: full R if small (full-dim blocks are always layout-legal), else a
    sublane-aligned chunk.  TILE_P: bounded by the per-buffer VMEM budget and by
    keeping >= _MIN_J_STEPS grid steps along the lane axis; always a multiple of
    128 (or the full dim).  Remainder blocks are padded/masked by the pipeline.
    """
    sub_align = 8 * max(1, 4 // elem_bytes)          # 8 (f32), 16 (bf16), 32 (int8)
    if R <= _MAX_TILE_R:
        tile_r = R
    else:
        tile_r = _round_down_multiple(_MAX_TILE_R, sub_align)

    if P <= 128:
        tile_p = P
    else:
        budget_lanes = _PER_BUFFER_VMEM_BUDGET // max(1, tile_r * elem_bytes)
        steps_cap = -(-P // _MIN_J_STEPS)            # ceil(P / min_j_steps)
        tile_p = min(P, budget_lanes, steps_cap)
        tile_p = max(128, _round_down_multiple(tile_p, 128))
    return tile_r, tile_p


def scaling_layer(x_nchw, shift, scale, *, use_pallas=None):
    """(x - shift) / scale with per-channel shift/scale, NCHW in -> NCHW out.

    Math runs in f32 (like the PyTorch module's f32 buffers); output keeps the
    input dtype.  `use_pallas=None` auto-dispatches: tiny inputs use plain jnp.
    """
    B, C, H, W = x_nchw.shape
    R, P = B * C, H * W

    shift_f32 = shift.reshape(-1).astype(jnp.float32)
    inv_scale_f32 = 1.0 / scale.reshape(-1).astype(jnp.float32)

    if use_pallas is None:
        use_pallas = x_nchw.size * x_nchw.dtype.itemsize >= _PALLAS_MIN_BYTES

    if not use_pallas:
        y = (x_nchw.astype(jnp.float32) - shift_f32.reshape(1, C, 1, 1)) \
            * inv_scale_f32.reshape(1, C, 1, 1)
        return y.astype(x_nchw.dtype)

    # Lane-dense 2D view: rows = (batch, channel), lanes = spatial (H*W) -> unmasked vst.
    x2 = x_nchw.reshape(R, P)

    # Per-row f32 shift / inv_scale columns (tiny: B*C values each).
    shift_col = jnp.broadcast_to(shift_f32.reshape(1, C), (B, C)).reshape(R, 1)
    inv_col = jnp.broadcast_to(inv_scale_f32.reshape(1, C), (B, C)).reshape(R, 1)

    TILE_R, TILE_P = _choose_tiles(R, P, x2.dtype.itemsize)
    grid = (pl.cdiv(R, TILE_R), pl.cdiv(P, TILE_P))

    out2 = pl.pallas_call(
        _scaling_kernel,
        out_shape=jax.ShapeDtypeStruct((R, P), x2.dtype),
        grid=grid,
        in_specs=[
            pl.BlockSpec((TILE_R, TILE_P), lambda i, j: (i, j)),
            pl.BlockSpec((TILE_R, 1), lambda i, j: (i, 0)),
            pl.BlockSpec((TILE_R, 1), lambda i, j: (i, 0)),
        ],
        out_specs=pl.BlockSpec((TILE_R, TILE_P), lambda i, j: (i, j)),
        compiler_params=pltpu.CompilerParams(
            dimension_semantics=("parallel", "parallel"),
            vmem_limit_bytes=32 * 1024 * 1024,
        ),
    )(x2, shift_col, inv_col)

    return out2.reshape(B, C, H, W)


if __name__ == "__main__":
    key = jax.random.PRNGKey(0)

    # ScalingLayer operates on 3-channel NCHW images (shift/scale have 3 entries).
    B, C, H, W = 2, 3, 64, 64
    x = jax.random.uniform(key, (B, C, H, W), jnp.float32, minval=-1.0, maxval=1.0)

    # The module's registered buffers.
    shift = jnp.array([-0.030, -0.088, -0.188], jnp.float32)
    scale = jnp.array([0.458, 0.448, 0.450], jnp.float32)

    # Force the Pallas path so the kernel is exercised at this (small) demo size.
    fwd = jax.jit(lambda a, s, sc: scaling_layer(a, s, sc, use_pallas=True))
    out = jax.block_until_ready(fwd(x, shift, scale))

    # Reference: the plain-JAX equivalent of the PyTorch forward (exact divide).
    ref = (x - shift.reshape(1, C, 1, 1)) / scale.reshape(1, C, 1, 1)
    assert out.shape == (B, C, H, W), out.shape
    assert bool(jnp.all(jnp.isfinite(out)))
    assert bool(jnp.allclose(out, ref, rtol=1e-6, atol=1e-6))

    # Auto-dispatch path (tiny input -> plain jnp bypass) must agree as well.
    out_auto = jax.block_until_ready(jax.jit(scaling_layer)(x, shift, scale))
    assert bool(jnp.allclose(out_auto, ref, rtol=1e-6, atol=1e-6))

    print("KERNEL_OK")
</pallas_src>

<mosaic_0001>
module attributes {stable_mosaic.version = 11 : i64} {
  func.func @_scaling_kernel(%arg0: i32, %arg1: i32, %arg2: memref<6x1024xf32, #tpu.memory_space<vmem>>, %arg3: memref<6x1xf32, #tpu.memory_space<vmem>>, %arg4: memref<6x1xf32, #tpu.memory_space<vmem>>, %arg5: memref<6x1024xf32, #tpu.memory_space<vmem>>) attributes {dimension_semantics = [#tpu.dimension_semantics<parallel>, #tpu.dimension_semantics<parallel>], iteration_bounds = array<i64: 1, 4>, scalar_prefetch = 0 : i64, scratch_operands = 0 : i64, tpu.core_type = #tpu.core_type<tc>, window_params = [{transform_indices = @transform_0, window_bounds = array<i64: 6, 1024>}, {transform_indices = @transform_1, window_bounds = array<i64: 6, 1>}, {transform_indices = @transform_2, window_bounds = array<i64: 6, 1>}, {transform_indices = @transform_3, window_bounds = array<i64: 6, 1024>}]} {
    %c0 = arith.constant 0 : index
    %c0_0 = arith.constant 0 : index
    %0 = vector.load %arg2[%c0, %c0_0] : memref<6x1024xf32, #tpu.memory_space<vmem>>, vector<6x1024xf32>
    %c0_1 = arith.constant 0 : index
    %c0_2 = arith.constant 0 : index
    %1 = vector.load %arg3[%c0_1, %c0_2] : memref<6x1xf32, #tpu.memory_space<vmem>>, vector<6x1xf32>
    %2 = vector.broadcast %1 : vector<6x1xf32> to vector<6x1024xf32>
    %3 = arith.subf %0, %2 : vector<6x1024xf32>
    %c0_3 = arith.constant 0 : index
    %c0_4 = arith.constant 0 : index
    %4 = vector.load %arg4[%c0_3, %c0_4] : memref<6x1xf32, #tpu.memory_space<vmem>>, vector<6x1xf32>
    %5 = vector.broadcast %4 : vector<6x1xf32> to vector<6x1024xf32>
    %6 = arith.mulf %3, %5 : vector<6x1024xf32>
    %c0_5 = arith.constant 0 : index
    %c0_6 = arith.constant 0 : index
    %7 = vector.load %arg5[%c0_5, %c0_6] : memref<6x1024xf32, #tpu.memory_space<vmem>>, vector<6x1024xf32>
    tpu.vector_store %arg5[%c0_5, %c0_6], %6 {strides = array<i32>} : memref<6x1024xf32, #tpu.memory_space<vmem>>, vector<6x1024xf32>,
    return
  }
  func.func @transform_0(%arg0: i32, %arg1: i32) -> (i32, i32) {
    %c0_i32 = arith.constant 0 : i32
    return %arg0, %arg1 : i32, i32
  }
  func.func @transform_1(%arg0: i32, %arg1: i32) -> (i32, i32) {
    %c0_i32 = arith.constant 0 : i32
    %c0_i32_0 = arith.constant 0 : i32
    return %arg0, %c0_i32 : i32, i32
  }
  func.func @transform_2(%arg0: i32, %arg1: i32) -> (i32, i32) {
    %c0_i32 = arith.constant 0 : i32
    %c0_i32_0 = arith.constant 0 : i32
    return %arg0, %c0_i32 : i32, i32
  }
  func.func @transform_3(%arg0: i32, %arg1: i32) -> (i32, i32) {
    %c0_i32 = arith.constant 0 : i32
    return %arg0, %arg1 : i32, i32
  }
}

</mosaic_0001>

<bundles_post_ra>
// kernel: _lambda_.1
= control target key start
LH: loop header
LB: loop body
LE: loop exit
PB: predicated region body
PF: predicated region fallthrough
CT: control target
= control target key end

     0   :  { %s489_s12 = smov 0   ;;  %s491_s13 = smov 0   ;;  %s528_s0 = inlined_call_operand.vmem [shape: f32[6,4096], index: 0, kind: input, shape index: {}]   ;;  %s529_s1 = inlined_call_operand.vmem [shape: f32[6,1], index: 1, kind: input, shape index: {}]   ;;  %s530_s2 = inlined_call_operand.vmem [shape: f32[6,1], index: 2, kind: input, shape index: {}]   ;;  %s531_s3 = inlined_call_operand.vmem [shape: f32[6,4096], index: 3, kind: output, shape index: {}]  }
   0x1   :  { %s493_s14 = smov 0  }
   0x2 LB: > { %s22_s15 = sadd.s32 1, %s462_s13  ;;  %p411_p0 = scmp.ge.s32.totalorder %s466_s14, 1  ;;  %s466_s14 = sphi %s493_s14, %s13_s14   ;;  %s462_s13 = sphi %s491_s13, %s533_s13   ;;  %s458_s12 = sphi %s489_s12, %s532_s12  }
   0x3   : > { %p23_p1 = scmp.ge.s32.totalorder %s22_s15, 4  ;;  %p176_p2 = scmp.lt.s32.totalorder %s466_s14, 5 }
   0x5   : > { %s535_s15 = smov (%p23_p1, %s22_s15), 0  ;;  %p177_p3 = pnand %p411_p0, %p176_p2 }
   0x6   : > { %s412_s20 = sshll.u32 (!%p177_p3), %s458_s12, 3 }
   0x7   : > { %180 = sbr.rel (%p177_p3) target bundleno = 148 (0x94), region = 32  ;;  %p219_p4 = scmp.lt.s32.totalorder (!%p177_p3), %s412_s20, 31 }
   0xc   : > { %v252_v0 = vld [vmem:[%s529_s1] sm:$0x3f]  ;;  %v468_v1 = vmov 0   ;;  %s537_s20 = smov (!%p219_p4, %s412_s20), 31 }
   0xd   : > { %443 = vset.pattern.permute.xlu0 %v468_v1  ;;  %v266_v2 = vld [vmem:[%s530_s2] sm:$0x3f]  ;;  %s413_s21 = sshll.u32 %s537_s20, 3 }
   0xe   : > { %255 = vperm.xlu0 %443, %v252_v0   ;;  %s224_s24 = scalar_lea.vmem %s528_s0, %s413_s21  ;;  %s242_s27 = scalar_lea.vmem %s531_s3, %s413_s21 }
   0xf   : > { %v244_v3 = vld [vmem:[%s224_s24] sm:$0x3f]  ;;  %v245_v4 = vld [vmem:[%s224_s24 + $0x8] sm:$0x3f]  ;;  %v246_v6 = vld [vmem:[%s224_s24 + $0x10] sm:$0x3f] }
  0x10   : > { %v247_v7 = vld [vmem:[%s224_s24 + $0x18] sm:$0x3f]  ;;  %v248_v8 = vld [vmem:[%s224_s24 + $0x20] sm:$0x3f]  ;;  %v249_v9 = vld [vmem:[%s224_s24 + $0x28] sm:$0x3f] }
  0x11   : > { %v250_v10 = vld [vmem:[%s224_s24 + $0x30] sm:$0x3f]  ;;  %v251_v11 = vld [vmem:[%s224_s24 + $0x38] sm:$0x3f] }
  0x12   : > { %269 = vperm.xlu0 %443, %v266_v2  }
  0x89   : > { %v256_v5 = vpop.permute.xlu0 %255 }
  0x8a   : > { %v258_v12 = vsub.f32 %v244_v3, %v256_v5  ;;  %v259_v13 = vsub.f32 %v245_v4, %v256_v5  ;;  %v260_v14 = vsub.f32 %v246_v6, %v256_v5  ;;  %v261_v15 = vsub.f32 %v247_v7, %v256_v5 }
  0x8b   : > { %v262_v17 = vsub.f32 %v248_v8, %v256_v5  ;;  %v263_v18 = vsub.f32 %v249_v9, %v256_v5  ;;  %v264_v19 = vsub.f32 %v250_v10, %v256_v5  ;;  %v265_v20 = vsub.f32 %v251_v11, %v256_v5 }
  0x8d   : > { %v270_v16 = vpop.permute.xlu0 %269 }
  0x8e   : > { %v272_v21 = vmul.f32 %v270_v16, %v258_v12  ;;  %v273_v22 = vmul.f32 %v270_v16, %v259_v13  ;;  %v274_v23 = vmul.f32 %v270_v16, %v260_v14  ;;  %v275_v24 = vmul.f32 %v270_v16, %v261_v15 }
  0x8f   : > { %v276_v25 = vmul.f32 %v270_v16, %v262_v17  ;;  %v277_v26 = vmul.f32 %v270_v16, %v263_v18  ;;  %v278_v27 = vmul.f32 %v270_v16, %v264_v19  ;;  %v279_v28 = vmul.f32 %v270_v16, %v265_v20 }
  0x90   : > { %280 = vst [vmem:[%s242_s27] sm:$0x3f] %v272_v21  ;;  %281 = vst [vmem:[%s242_s27 + $0x8] sm:$0x3f] %v273_v22 }
  0x91   : > { %282 = vst [vmem:[%s242_s27 + $0x10] sm:$0x3f] %v274_v23  ;;  %283 = vst [vmem:[%s242_s27 + $0x18] sm:$0x3f] %v275_v24 }
  0x92   : > { %284 = vst [vmem:[%s242_s27 + $0x20] sm:$0x3f] %v276_v25  ;;  %285 = vst [vmem:[%s242_s27 + $0x28] sm:$0x3f] %v277_v26 }
  0x93   : > { %286 = vst [vmem:[%s242_s27 + $0x30] sm:$0x3f] %v278_v27  ;;  %287 = vst [vmem:[%s242_s27 + $0x38] sm:$0x3f] %v279_v28 }
  0x94 PF: > { %s13_s14 = sadd.s32 1, %s466_s14   ;;  %s532_s12 = smov %s462_s13 }
  0x95   : > { %p10_p5 = scmp.ge.s32.totalorder %s13_s14, 6   ;;  %s533_s13 = smov %s535_s15 }
  0x97   :  { %12 = sbr.rel (!%p10_p5) target bundleno = 2 (0x2), region = 68 }

</bundles_post_ra>
